<compile_context>
chip_gen: v5e
topology: v5e:2x2
jax: 0.10.0
libtpu: 0.0.40
codegen_flags: <defaults>
</compile_context>

<pallas_src>
import functools
import math

import jax
import jax.numpy as jnp
from jax.experimental import pallas as pl
from jax.experimental.pallas import tpu as pltpu

BN_EPS = 1e-5


# ------------------------------ fused kernel ---------------------------------

def _diffusion_tcn_kernel(x_ref, temb_ref, w_ref, v_ref, o_ref, *, cin, cout, length):
    L = length
    f32 = jnp.float32

    x = x_ref[0]            # (cin, L)   NCL layout: channels on sublanes, time on lanes
    temb = temb_ref[0]      # (cout, 1)  broadcast over L

    # ---- hoisted lane-index masks, shared by every conv3 / the pool ----
    cols = jax.lax.broadcasted_iota(jnp.int32, (1, L), 1)
    not_first = (cols > 0).astype(f32)          # zero at t == 0     (left conv padding)
    not_last = (cols < L - 1).astype(f32)       # zero at t == L-1   (right conv padding)
    even_f = ((cols % 2) == 0).astype(f32)
    odd_f = 1.0 - even_f

    def shift3(a):
        # (C, L) -> (3C, L): [a[:, t-1]; a[:, t]; a[:, t+1]] with zero padding at borders.
        am1 = pltpu.roll(a, shift=1, axis=1) * not_first
        ap1 = pltpu.roll(a, shift=L - 1, axis=1) * not_last
        return jnp.concatenate([am1, a, ap1], axis=0)

    def silu(z):
        # z * sigmoid(z), sigmoid via tanh: one EUP op per element.
        return z * (0.5 * jnp.tanh(0.5 * z) + 0.5)

    def col(idx, c):
        # per-channel column (c, 1) from the packed vector slab (static slice).
        return v_ref[0:c, idx:idx + 1]

    # ---- static slices of the packed matmul-weight slab ----
    r = 0
    w_in = w_ref[r:r + cin, 0:cin];            r += cin          # input 1x1 conv
    w_d1 = w_ref[r:r + cout, 0:3 * cin];       r += cout         # down conv3 #1
    w_d2 = w_ref[r:r + cout, 0:3 * cout];      r += cout         # down conv3 #2
    w_t = w_ref[r:r + 2 * cout, 0:cout];       r += 2 * cout     # convtranspose (even|odd taps)
    w_u1 = w_ref[r:r + cout, 0:6 * cout];      r += cout         # up conv3 #1 (on 2*cout concat)
    w_u2 = w_ref[r:r + cout, 0:3 * cout];      r += cout         # up conv3 #2
    w_out = w_ref[r:r + cin, 0:cout]                              # output 1x1 conv

    # ---- input_conv (1x1) ----
    h = jnp.dot(w_in, x, preferred_element_type=f32) + col(0, cin)
    # TODO(synk): prompt path (F.pad + add after input_conv) not implemented; prompt=None here.

    # ---- down TCNBlock: (conv3 -> BN -> SiLU) x2 ; conv bias folded into BN shift ----
    x1 = silu(jnp.dot(w_d1, shift3(h), preferred_element_type=f32) * col(1, cout) + col(2, cout))
    x2 = silu(jnp.dot(w_d2, shift3(x1), preferred_element_type=f32) * col(3, cout) + col(4, cout))

    # ---- skip branch: MaxPool1d(2) + ConvTranspose1d(k=2, s=2) on the PRE-temb x2 ----
    m = jnp.maximum(x2, pltpu.roll(x2, shift=L - 1, axis=1))       # m[:, t] = max(x2[t], x2[t+1])
    yt = jnp.dot(w_t, m, preferred_element_type=f32)               # (2*cout, L): [even taps; odd taps]
    up = (yt[0:cout, :] * even_f
          + pltpu.roll(yt[cout:2 * cout, :], shift=1, axis=1) * odd_f
          + col(5, cout))

    # ---- main branch: + timestep embedding, then channel-concat [x+temb, upsampled] ----
    xm = x2 + temb
    c = jnp.concatenate([xm, up], axis=0)                          # (2*cout, L), PyTorch concat order

    # ---- up TCNBlock: first conv = ONE (cout, 6*cout) @ (6*cout, L) matmul ----
    y1 = silu(jnp.dot(w_u1, shift3(c), preferred_element_type=f32) * col(6, cout) + col(7, cout))
    y2 = silu(jnp.dot(w_u2, shift3(y1), preferred_element_type=f32) * col(8, cout) + col(9, cout))

    # ---- out_conv (1x1) ----
    out = jnp.dot(w_out, y2, preferred_element_type=f32) + col(10, cin)
    o_ref[0] = out.astype(o_ref.dtype)


# ------------------------------ glue / parameters ----------------------------

def timestep_embedding(timesteps, dim, max_period=10000):
    half = dim // 2
    freqs = jnp.exp(-math.log(max_period) * jnp.arange(half, dtype=jnp.float32) / half)
    args = timesteps.astype(jnp.float32)[:, None] * freqs[None]
    emb = jnp.concatenate([jnp.cos(args), jnp.sin(args)], axis=-1)   # cos-then-sin, as in torch ref
    if dim % 2:
        emb = jnp.concatenate([emb, jnp.zeros_like(emb[:, :1])], axis=-1)
    return emb  # (B, dim); broadcast over L inside the kernel


def init_params(key, cin, cout):
    keys = iter(jax.random.split(key, 32))

    def conv_w(co, ci, k):
        return jax.random.normal(next(keys), (co, ci, k), jnp.float32) / math.sqrt(ci * k)

    def bias(c):
        return 0.1 * jax.random.normal(next(keys), (c,), jnp.float32)

    def bn(c):
        gamma = 1.0 + 0.1 * jax.random.normal(next(keys), (c,), jnp.float32)
        beta = 0.1 * jax.random.normal(next(keys), (c,), jnp.float32)
        mean = 0.1 * jax.random.normal(next(keys), (c,), jnp.float32)
        var = jax.random.uniform(next(keys), (c,), jnp.float32, 0.5, 1.5)
        scale = gamma / jnp.sqrt(var + BN_EPS)
        shift = beta - mean * scale
        return scale, shift

    def pack3(w):
        # torch Conv1d weight (Co, Ci, 3) -> (Co, 3*Ci); tap k multiplies x[t-1+k]
        return jnp.concatenate([w[:, :, 0], w[:, :, 1], w[:, :, 2]], axis=1)

    # ---- raw torch-layout parameters ----
    w_in = conv_w(cin, cin, 1);          b_in = bias(cin)
    w_d1 = conv_w(cout, cin, 3);         b_d1 = bias(cout)
    w_d2 = conv_w(cout, cout, 3);        b_d2 = bias(cout)
    s_d1, t_d1 = bn(cout)
    s_d2, t_d2 = bn(cout)
    w_t = jax.random.normal(next(keys), (cout, cout, 2), jnp.float32) / math.sqrt(2 * cout)
    b_t = bias(cout)
    w_u1 = conv_w(cout, 2 * cout, 3);    b_u1 = bias(cout)
    w_u2 = conv_w(cout, cout, 3);        b_u2 = bias(cout)
    s_u1, t_u1 = bn(cout)
    s_u2, t_u2 = bn(cout)
    w_out = conv_w(cin, cout, 1);        b_out = bias(cin)

    # ---- packed matmul-weight slab: row-stacked, column-padded to max K ----
    kmax = max(3 * cin, 6 * cout)

    def pad_cols(w):
        return jnp.pad(w, ((0, 0), (0, kmax - w.shape[1])))

    wslab = jnp.concatenate([
        pad_cols(w_in[:, :, 0]),                                             # (cin,    cin)
        pad_cols(pack3(w_d1)),                                               # (cout,   3*cin)
        pad_cols(pack3(w_d2)),                                               # (cout,   3*cout)
        pad_cols(jnp.concatenate([w_t[:, :, 0].T, w_t[:, :, 1].T], axis=0)),  # (2*cout, cout)
        pad_cols(pack3(w_u1)),                                               # (cout,   6*cout)
        pad_cols(pack3(w_u2)),                                               # (cout,   3*cout)
        pad_cols(w_out[:, :, 0]),                                            # (cin,    cout)
    ], axis=0)                                                               # (2*cin + 6*cout, kmax)

    # ---- packed per-channel column slab; conv bias folded into BN shift ----
    cmax = max(cin, cout)

    def pad_rows(v):
        return jnp.pad(v, (0, cmax - v.shape[0]))

    vecs = [b_in,
            s_d1, t_d1 + s_d1 * b_d1,
            s_d2, t_d2 + s_d2 * b_d2,
            b_t,
            s_u1, t_u1 + s_u1 * b_u1,
            s_u2, t_u2 + s_u2 * b_u2,
            b_out]
    vslab = jnp.stack([pad_rows(v) for v in vecs], axis=1)                   # (cmax, 11)

    return {'wslab': wslab, 'vslab': vslab}


@jax.jit
def diffusion_tcn_forward(params, noise_ncl, step):
    # noise_ncl: (B, Cin, L) in the PyTorch NCL layout — consumed directly (no transposes).
    B, Cin, L = noise_ncl.shape
    wslab, vslab = params['wslab'], params['vslab']
    Cout = (wslab.shape[0] - 2 * Cin) // 6
    assert L % 2 == 0, "maxpool(2)+ConvTranspose1d(2,2) skip requires even L (as in PyTorch)"

    temb = timestep_embedding(step, Cout)[:, :, None]              # (B, Cout, 1)
    kernel = functools.partial(_diffusion_tcn_kernel, cin=Cin, cout=Cout, length=L)

    return pl.pallas_call(
        kernel,
        out_shape=jax.ShapeDtypeStruct((B, Cin, L), noise_ncl.dtype),
        grid=(B,),
        in_specs=[
            pl.BlockSpec((1, Cin, L), lambda i: (i, 0, 0)),
            pl.BlockSpec((1, Cout, 1), lambda i: (i, 0, 0)),
            pl.BlockSpec(wslab.shape, lambda i: (0, 0)),    # grid-invariant: DMA'd once
            pl.BlockSpec(vslab.shape, lambda i: (0, 0)),    # grid-invariant: DMA'd once
        ],
        out_specs=pl.BlockSpec((1, Cin, L), lambda i: (i, 0, 0)),
        compiler_params=pltpu.CompilerParams(dimension_semantics=("parallel",)),
    )(noise_ncl, temb, wslab, vslab)


if __name__ == "__main__":
    B, Cin, Cout, L = 2, 4, 8, 16
    key = jax.random.PRNGKey(0)
    kp, kn, ks = jax.random.split(key, 3)
    params = init_params(kp, Cin, Cout)
    noise = jax.random.normal(kn, (B, Cin, L), jnp.float32)
    step = jax.random.randint(ks, (B,), 0, 1000)
    out = diffusion_tcn_forward(params, noise, step)
    out = jax.block_until_ready(out)
    assert out.shape == (B, Cin, L) and out.dtype == jnp.float32
    assert bool(jnp.isfinite(out).all())
    print("KERNEL_OK")
</pallas_src>

<mosaic_0001>
module attributes {stable_mosaic.version = 11 : i64} {
  func.func @_diffusion_tcn_kernel(%arg0: i32, %arg1: memref<1x4x16xf32, #tpu.memory_space<vmem>>, %arg2: memref<1x8x1xf32, #tpu.memory_space<vmem>>, %arg3: memref<56x48xf32, #tpu.memory_space<vmem>>, %arg4: memref<8x11xf32, #tpu.memory_space<vmem>>, %arg5: memref<1x4x16xf32, #tpu.memory_space<vmem>>) attributes {dimension_semantics = [#tpu.dimension_semantics<parallel>], iteration_bounds = array<i64: 2>, scalar_prefetch = 0 : i64, scratch_operands = 0 : i64, tpu.core_type = #tpu.core_type<tc>, window_params = [{transform_indices = @transform_0, window_bounds = array<i64: 1, 4, 16>}, {transform_indices = @transform_1, window_bounds = array<i64: 1, 8, 1>}, {pipeline_mode = #tpu.pipeline_mode<synchronous>, transform_indices = @transform_2, window_bounds = array<i64: 56, 48>}, {pipeline_mode = #tpu.pipeline_mode<synchronous>, transform_indices = @transform_3, window_bounds = array<i64: 8, 11>}, {transform_indices = @transform_4, window_bounds = array<i64: 1, 4, 16>}]} {
    %c0 = arith.constant 0 : index
    %c0_0 = arith.constant 0 : index
    %c0_1 = arith.constant 0 : index
    %0 = vector.load %arg1[%c0, %c0_0, %c0_1] : memref<1x4x16xf32, #tpu.memory_space<vmem>>, vector<1x4x16xf32>
    %1 = vector.shape_cast %0 : vector<1x4x16xf32> to vector<4x16xf32>
    %c0_2 = arith.constant 0 : index
    %c0_3 = arith.constant 0 : index
    %c0_4 = arith.constant 0 : index
    %2 = vector.load %arg2[%c0_2, %c0_3, %c0_4] : memref<1x8x1xf32, #tpu.memory_space<vmem>>, vector<1x8x1xf32>
    %3 = vector.shape_cast %2 : vector<1x8x1xf32> to vector<8x1xf32>
    %4 = tpu.iota {dimensions = array<i32: 1>} : vector<1x16xi32>
    %c0_i32 = arith.constant 0 : i32
    %5 = vector.broadcast %c0_i32 : i32 to vector<1x16xi32>
    %6 = arith.cmpi sgt, %4, %5 : vector<1x16xi32>
    %7 = arith.extui %6 : vector<1x16xi1> to vector<1x16xi32>
    %8 = arith.sitofp %7 : vector<1x16xi32> to vector<1x16xf32>
    %c15_i32 = arith.constant 15 : i32
    %9 = vector.broadcast %c15_i32 : i32 to vector<1x16xi32>
    %10 = arith.cmpi slt, %4, %9 : vector<1x16xi32>
    %11 = arith.extui %10 : vector<1x16xi1> to vector<1x16xi32>
    %12 = arith.sitofp %11 : vector<1x16xi32> to vector<1x16xf32>
    %c2_i32 = arith.constant 2 : i32
    %c0_i32_5 = arith.constant 0 : i32
    %13 = arith.cmpi eq, %c2_i32, %c0_i32_5 : i32
    %c1_i32 = arith.constant 1 : i32
    %14 = arith.select %13, %c1_i32, %c2_i32 : i32
    %15 = vector.broadcast %14 : i32 to vector<1x16xi32>
    %16 = arith.remsi %4, %15 : vector<1x16xi32>
    %c0_i32_6 = arith.constant 0 : i32
    %17 = vector.broadcast %c0_i32_6 : i32 to vector<1x16xi32>
    %18 = arith.cmpi ne, %16, %17 : vector<1x16xi32>
    %c0_i32_7 = arith.constant 0 : i32
    %19 = vector.broadcast %c0_i32_7 : i32 to vector<1x16xi32>
    %20 = arith.cmpi slt, %16, %19 : vector<1x16xi32>
    %c0_i32_8 = arith.constant 0 : i32
    %21 = arith.cmpi slt, %14, %c0_i32_8 : i32
    %22 = vector.broadcast %21 : i1 to vector<1x16xi1>
    %23 = vector.broadcast %22 : vector<1x16xi1> to vector<1x16xi1>
    %24 = arith.xori %20, %23 : vector<1x16xi1>
    %25 = arith.andi %24, %18 : vector<1x16xi1>
    %26 = vector.broadcast %14 : i32 to vector<1x16xi32>
    %27 = arith.addi %16, %26 : vector<1x16xi32>
    %28 = arith.select %25, %27, %16 : vector<1x16xi1>, vector<1x16xi32>
    %c0_i32_9 = arith.constant 0 : i32
    %29 = vector.broadcast %c0_i32_9 : i32 to vector<1x16xi32>
    %30 = arith.cmpi eq, %28, %29 : vector<1x16xi32>
    %31 = arith.extui %30 : vector<1x16xi1> to vector<1x16xi32>
    %32 = arith.sitofp %31 : vector<1x16xi32> to vector<1x16xf32>
    %cst = arith.constant 1.000000e+00 : f32
    %33 = vector.broadcast %cst : f32 to vector<1x16xf32>
    %34 = arith.subf %33, %32 : vector<1x16xf32>
    %c0_10 = arith.constant 0 : index
    %c0_11 = arith.constant 0 : index
    %35 = vector.load %arg3[%c0_10, %c0_11] : memref<56x48xf32, #tpu.memory_space<vmem>>, vector<4x4xf32>
    %c4 = arith.constant 4 : index
    %c0_12 = arith.constant 0 : index
    %36 = vector.load %arg3[%c4, %c0_12] : memref<56x48xf32, #tpu.memory_space<vmem>>, vector<8x12xf32>
    %c12 = arith.constant 12 : index
    %c0_13 = arith.constant 0 : index
    %37 = vector.load %arg3[%c12, %c0_13] : memref<56x48xf32, #tpu.memory_space<vmem>>, vector<8x24xf32>
    %c20 = arith.constant 20 : index
    %c0_14 = arith.constant 0 : index
    %38 = vector.load %arg3[%c20, %c0_14] : memref<56x48xf32, #tpu.memory_space<vmem>>, vector<16x8xf32>
    %c36 = arith.constant 36 : index
    %c0_15 = arith.constant 0 : index
    %39 = vector.load %arg3[%c36, %c0_15] : memref<56x48xf32, #tpu.memory_space<vmem>>, vector<8x48xf32>
    %c44 = arith.constant 44 : index
    %c0_16 = arith.constant 0 : index
    %40 = vector.load %arg3[%c44, %c0_16] : memref<56x48xf32, #tpu.memory_space<vmem>>, vector<8x24xf32>
    %c52 = arith.constant 52 : index
    %c0_17 = arith.constant 0 : index
    %41 = vector.load %arg3[%c52, %c0_17] : memref<56x48xf32, #tpu.memory_space<vmem>>, vector<4x8xf32>
    %cst_18 = arith.constant dense<0.000000e+00> : vector<4x16xf32>
    %42 = tpu.matmul %35, %1, %cst_18 {dimension_numbers = #tpu.dot_dimension_numbers<[1], [0], [0], [1], [0, 0, 1, 1], [], []>} : vector<4x4xf32>, vector<4x16xf32>, vector<4x16xf32> -> vector<4x16xf32>
    %c0_19 = arith.constant 0 : index
    %c0_20 = arith.constant 0 : index
    %43 = vector.load %arg4[%c0_19, %c0_20] : memref<8x11xf32, #tpu.memory_space<vmem>>, vector<4x1xf32>
    %44 = vector.broadcast %43 : vector<4x1xf32> to vector<4x16xf32>
    %45 = arith.addf %42, %44 : vector<4x16xf32>
    %c1_i32_21 = arith.constant 1 : i32
    %46 = tpu.dynamic_rotate %45 by %c1_i32_21 dim 1 : vector<4x16xf32>, i32 -> vector<4x16xf32>
    %47 = vector.broadcast %8 : vector<1x16xf32> to vector<4x16xf32>
    %48 = arith.mulf %46, %47 : vector<4x16xf32>
    %c15_i32_22 = arith.constant 15 : i32
    %49 = tpu.dynamic_rotate %45 by %c15_i32_22 dim 1 : vector<4x16xf32>, i32 -> vector<4x16xf32>
    %50 = vector.broadcast %12 : vector<1x16xf32> to vector<4x16xf32>
    %51 = arith.mulf %49, %50 : vector<4x16xf32>
    %52 = tpu.concatenate %48, %45, %51 in 0 : vector<4x16xf32>, vector<4x16xf32>, vector<4x16xf32> -> vector<12x16xf32>
    %cst_23 = arith.constant dense<0.000000e+00> : vector<8x16xf32>
    %53 = tpu.matmul %36, %52, %cst_23 {dimension_numbers = #tpu.dot_dimension_numbers<[1], [0], [0], [1], [0, 0, 1, 1], [], []>} : vector<8x12xf32>, vector<12x16xf32>, vector<8x16xf32> -> vector<8x16xf32>
    %c0_24 = arith.constant 0 : index
    %c1 = arith.constant 1 : index
    %54 = vector.load %arg4[%c0_24, %c1] : memref<8x11xf32, #tpu.memory_space<vmem>>, vector<8x1xf32>
    %55 = vector.broadcast %54 : vector<8x1xf32> to vector<8x16xf32>
    %56 = arith.mulf %53, %55 : vector<8x16xf32>
    %c0_25 = arith.constant 0 : index
    %c2 = arith.constant 2 : index
    %57 = vector.load %arg4[%c0_25, %c2] : memref<8x11xf32, #tpu.memory_space<vmem>>, vector<8x1xf32>
    %58 = vector.broadcast %57 : vector<8x1xf32> to vector<8x16xf32>
    %59 = arith.addf %56, %58 : vector<8x16xf32>
    %cst_26 = arith.constant 5.000000e-01 : f32
    %60 = vector.broadcast %cst_26 : f32 to vector<8x16xf32>
    %61 = arith.mulf %60, %59 : vector<8x16xf32>
    %62 = math.tanh %61 : vector<8x16xf32>
    %cst_27 = arith.constant 5.000000e-01 : f32
    %63 = vector.broadcast %cst_27 : f32 to vector<8x16xf32>
    %64 = arith.mulf %63, %62 : vector<8x16xf32>
    %cst_28 = arith.constant 5.000000e-01 : f32
    %65 = vector.broadcast %cst_28 : f32 to vector<8x16xf32>
    %66 = arith.addf %64, %65 : vector<8x16xf32>
    %67 = arith.mulf %59, %66 : vector<8x16xf32>
    %c1_i32_29 = arith.constant 1 : i32
    %68 = tpu.dynamic_rotate %67 by %c1_i32_29 dim 1 : vector<8x16xf32>, i32 -> vector<8x16xf32>
    %69 = vector.broadcast %8 : vector<1x16xf32> to vector<8x16xf32>
    %70 = arith.mulf %68, %69 : vector<8x16xf32>
    %c15_i32_30 = arith.constant 15 : i32
    %71 = tpu.dynamic_rotate %67 by %c15_i32_30 dim 1 : vector<8x16xf32>, i32 -> vector<8x16xf32>
    %72 = vector.broadcast %12 : vector<1x16xf32> to vector<8x16xf32>
    %73 = arith.mulf %71, %72 : vector<8x16xf32>
    %74 = tpu.concatenate %70, %67, %73 in 0 : vector<8x16xf32>, vector<8x16xf32>, vector<8x16xf32> -> vector<24x16xf32>
    %cst_31 = arith.constant dense<0.000000e+00> : vector<8x16xf32>
    %75 = tpu.matmul %37, %74, %cst_31 {dimension_numbers = #tpu.dot_dimension_numbers<[1], [0], [0], [1], [0, 0, 1, 1], [], []>} : vector<8x24xf32>, vector<24x16xf32>, vector<8x16xf32> -> vector<8x16xf32>
    %c0_32 = arith.constant 0 : index
    %c3 = arith.constant 3 : index
    %76 = vector.load %arg4[%c0_32, %c3] : memref<8x11xf32, #tpu.memory_space<vmem>>, vector<8x1xf32>
    %77 = vector.broadcast %76 : vector<8x1xf32> to vector<8x16xf32>
    %78 = arith.mulf %75, %77 : vector<8x16xf32>
    %c0_33 = arith.constant 0 : index
    %c4_34 = arith.constant 4 : index
    %79 = vector.load %arg4[%c0_33, %c4_34] : memref<8x11xf32, #tpu.memory_space<vmem>>, vector<8x1xf32>
    %80 = vector.broadcast %79 : vector<8x1xf32> to vector<8x16xf32>
    %81 = arith.addf %78, %80 : vector<8x16xf32>
    %cst_35 = arith.constant 5.000000e-01 : f32
    %82 = vector.broadcast %cst_35 : f32 to vector<8x16xf32>
    %83 = arith.mulf %82, %81 : vector<8x16xf32>
    %84 = math.tanh %83 : vector<8x16xf32>
    %cst_36 = arith.constant 5.000000e-01 : f32
    %85 = vector.broadcast %cst_36 : f32 to vector<8x16xf32>
    %86 = arith.mulf %85, %84 : vector<8x16xf32>
    %cst_37 = arith.constant 5.000000e-01 : f32
    %87 = vector.broadcast %cst_37 : f32 to vector<8x16xf32>
    %88 = arith.addf %86, %87 : vector<8x16xf32>
    %89 = arith.mulf %81, %88 : vector<8x16xf32>
    %c15_i32_38 = arith.constant 15 : i32
    %90 = tpu.dynamic_rotate %89 by %c15_i32_38 dim 1 : vector<8x16xf32>, i32 -> vector<8x16xf32>
    %91 = arith.maximumf %89, %90 : vector<8x16xf32>
    %cst_39 = arith.constant dense<0.000000e+00> : vector<16x16xf32>
    %92 = tpu.matmul %38, %91, %cst_39 {dimension_numbers = #tpu.dot_dimension_numbers<[1], [0], [0], [1], [0, 0, 1, 1], [], []>} : vector<16x8xf32>, vector<8x16xf32>, vector<16x16xf32> -> vector<16x16xf32>
    %93 = vector.extract_strided_slice %92 {offsets = [0, 0], sizes = [8, 16], strides = [1, 1]} : vector<16x16xf32> to vector<8x16xf32>
    %94 = vector.broadcast %32 : vector<1x16xf32> to vector<8x16xf32>
    %95 = arith.mulf %93, %94 : vector<8x16xf32>
    %96 = vector.extract_strided_slice %92 {offsets = [8, 0], sizes = [8, 16], strides = [1, 1]} : vector<16x16xf32> to vector<8x16xf32>
    %c1_i32_40 = arith.constant 1 : i32
    %97 = tpu.dynamic_rotate %96 by %c1_i32_40 dim 1 : vector<8x16xf32>, i32 -> vector<8x16xf32>
    %98 = vector.broadcast %34 : vector<1x16xf32> to vector<8x16xf32>
    %99 = arith.mulf %97, %98 : vector<8x16xf32>
    %100 = arith.addf %95, %99 : vector<8x16xf32>
    %c0_41 = arith.constant 0 : index
    %c5 = arith.constant 5 : index
    %101 = vector.load %arg4[%c0_41, %c5] : memref<8x11xf32, #tpu.memory_space<vmem>>, vector<8x1xf32>
    %102 = vector.broadcast %101 : vector<8x1xf32> to vector<8x16xf32>
    %103 = arith.addf %100, %102 : vector<8x16xf32>
    %104 = vector.broadcast %3 : vector<8x1xf32> to vector<8x16xf32>
    %105 = arith.addf %89, %104 : vector<8x16xf32>
    %106 = tpu.concatenate %105, %103 in 0 : vector<8x16xf32>, vector<8x16xf32> -> vector<16x16xf32>
    %c1_i32_42 = arith.constant 1 : i32
    %107 = tpu.dynamic_rotate %106 by %c1_i32_42 dim 1 : vector<16x16xf32>, i32 -> vector<16x16xf32>
    %108 = vector.broadcast %8 : vector<1x16xf32> to vector<16x16xf32>
    %109 = arith.mulf %107, %108 : vector<16x16xf32>
    %c15_i32_43 = arith.constant 15 : i32
    %110 = tpu.dynamic_rotate %106 by %c15_i32_43 dim 1 : vector<16x16xf32>, i32 -> vector<16x16xf32>
    %111 = vector.broadcast %12 : vector<1x16xf32> to vector<16x16xf32>
    %112 = arith.mulf %110, %111 : vector<16x16xf32>
    %113 = tpu.concatenate %109, %106, %112 in 0 : vector<16x16xf32>, vector<16x16xf32>, vector<16x16xf32> -> vector<48x16xf32>
    %cst_44 = arith.constant dense<0.000000e+00> : vector<8x16xf32>
    %114 = tpu.matmul %39, %113, %cst_44 {dimension_numbers = #tpu.dot_dimension_numbers<[1], [0], [0], [1], [0, 0, 1, 1], [], []>} : vector<8x48xf32>, vector<48x16xf32>, vector<8x16xf32> -> vector<8x16xf32>
    %c0_45 = arith.constant 0 : index
    %c6 = arith.constant 6 : index
    %115 = vector.load %arg4[%c0_45, %c6] : memref<8x11xf32, #tpu.memory_space<vmem>>, vector<8x1xf32>
    %116 = vector.broadcast %115 : vector<8x1xf32> to vector<8x16xf32>
    %117 = arith.mulf %114, %116 : vector<8x16xf32>
    %c0_46 = arith.constant 0 : index
    %c7 = arith.constant 7 : index
    %118 = vector.load %arg4[%c0_46, %c7] : memref<8x11xf32, #tpu.memory_space<vmem>>, vector<8x1xf32>
    %119 = vector.broadcast %118 : vector<8x1xf32> to vector<8x16xf32>
    %120 = arith.addf %117, %119 : vector<8x16xf32>
    %cst_47 = arith.constant 5.000000e-01 : f32
    %121 = vector.broadcast %cst_47 : f32 to vector<8x16xf32>
    %122 = arith.mulf %121, %120 : vector<8x16xf32>
    %123 = math.tanh %122 : vector<8x16xf32>
    %cst_48 = arith.constant 5.000000e-01 : f32
    %124 = vector.broadcast %cst_48 : f32 to vector<8x16xf32>
    %125 = arith.mulf %124, %123 : vector<8x16xf32>
    %cst_49 = arith.constant 5.000000e-01 : f32
    %126 = vector.broadcast %cst_49 : f32 to vector<8x16xf32>
    %127 = arith.addf %125, %126 : vector<8x16xf32>
    %128 = arith.mulf %120, %127 : vector<8x16xf32>
    %c1_i32_50 = arith.constant 1 : i32
    %129 = tpu.dynamic_rotate %128 by %c1_i32_50 dim 1 : vector<8x16xf32>, i32 -> vector<8x16xf32>
    %130 = vector.broadcast %8 : vector<1x16xf32> to vector<8x16xf32>
    %131 = arith.mulf %129, %130 : vector<8x16xf32>
    %c15_i32_51 = arith.constant 15 : i32
    %132 = tpu.dynamic_rotate %128 by %c15_i32_51 dim 1 : vector<8x16xf32>, i32 -> vector<8x16xf32>
    %133 = vector.broadcast %12 : vector<1x16xf32> to vector<8x16xf32>
    %134 = arith.mulf %132, %133 : vector<8x16xf32>
    %135 = tpu.concatenate %131, %128, %134 in 0 : vector<8x16xf32>, vector<8x16xf32>, vector<8x16xf32> -> vector<24x16xf32>
    %cst_52 = arith.constant dense<0.000000e+00> : vector<8x16xf32>
    %136 = tpu.matmul %40, %135, %cst_52 {dimension_numbers = #tpu.dot_dimension_numbers<[1], [0], [0], [1], [0, 0, 1, 1], [], []>} : vector<8x24xf32>, vector<24x16xf32>, vector<8x16xf32> -> vector<8x16xf32>
    %c0_53 = arith.constant 0 : index
    %c8 = arith.constant 8 : index
    %137 = vector.load %arg4[%c0_53, %c8] : memref<8x11xf32, #tpu.memory_space<vmem>>, vector<8x1xf32>
    %138 = vector.broadcast %137 : vector<8x1xf32> to vector<8x16xf32>
    %139 = arith.mulf %136, %138 : vector<8x16xf32>
    %c0_54 = arith.constant 0 : index
    %c9 = arith.constant 9 : index
    %140 = vector.load %arg4[%c0_54, %c9] : memref<8x11xf32, #tpu.memory_space<vmem>>, vector<8x1xf32>
    %141 = vector.broadcast %140 : vector<8x1xf32> to vector<8x16xf32>
    %142 = arith.addf %139, %141 : vector<8x16xf32>
    %cst_55 = arith.constant 5.000000e-01 : f32
    %143 = vector.broadcast %cst_55 : f32 to vector<8x16xf32>
    %144 = arith.mulf %143, %142 : vector<8x16xf32>
    %145 = math.tanh %144 : vector<8x16xf32>
    %cst_56 = arith.constant 5.000000e-01 : f32
    %146 = vector.broadcast %cst_56 : f32 to vector<8x16xf32>
    %147 = arith.mulf %146, %145 : vector<8x16xf32>
    %cst_57 = arith.constant 5.000000e-01 : f32
    %148 = vector.broadcast %cst_57 : f32 to vector<8x16xf32>
    %149 = arith.addf %147, %148 : vector<8x16xf32>
    %150 = arith.mulf %142, %149 : vector<8x16xf32>
    %cst_58 = arith.constant dense<0.000000e+00> : vector<4x16xf32>
    %151 = tpu.matmul %41, %150, %cst_58 {dimension_numbers = #tpu.dot_dimension_numbers<[1], [0], [0], [1], [0, 0, 1, 1], [], []>} : vector<4x8xf32>, vector<8x16xf32>, vector<4x16xf32> -> vector<4x16xf32>
    %c0_59 = arith.constant 0 : index
    %c10 = arith.constant 10 : index
    %152 = vector.load %arg4[%c0_59, %c10] : memref<8x11xf32, #tpu.memory_space<vmem>>, vector<4x1xf32>
    %153 = vector.broadcast %152 : vector<4x1xf32> to vector<4x16xf32>
    %154 = arith.addf %151, %153 : vector<4x16xf32>
    %c0_60 = arith.constant 0 : index
    %c0_61 = arith.constant 0 : index
    %c0_62 = arith.constant 0 : index
    %155 = vector.load %arg5[%c0_60, %c0_61, %c0_62] : memref<1x4x16xf32, #tpu.memory_space<vmem>>, vector<1x4x16xf32>
    %156 = vector.shape_cast %155 : vector<1x4x16xf32> to vector<4x16xf32>
    %157 = vector.shape_cast %154 : vector<4x16xf32> to vector<1x4x16xf32>
    tpu.vector_store %arg5[%c0_60, %c0_61, %c0_62], %157 {strides = array<i32>} : memref<1x4x16xf32, #tpu.memory_space<vmem>>, vector<1x4x16xf32>,
    return
  }
  func.func @transform_0(%arg0: i32) -> (i32, i32, i32) {
    %c0_i32 = arith.constant 0 : i32
    %c0_i32_0 = arith.constant 0 : i32
    %c0_i32_1 = arith.constant 0 : i32
    return %arg0, %c0_i32, %c0_i32_0 : i32, i32, i32
  }
  func.func @transform_1(%arg0: i32) -> (i32, i32, i32) {
    %c0_i32 = arith.constant 0 : i32
    %c0_i32_0 = arith.constant 0 : i32
    %c0_i32_1 = arith.constant 0 : i32
    return %arg0, %c0_i32, %c0_i32_0 : i32, i32, i32
  }
  func.func @transform_2(%arg0: i32) -> (i32, i32) {
    %c0_i32 = arith.constant 0 : i32
    %c0_i32_0 = arith.constant 0 : i32
    %c0_i32_1 = arith.constant 0 : i32
    return %c0_i32, %c0_i32_0 : i32, i32
  }
  func.func @transform_3(%arg0: i32) -> (i32, i32) {
    %c0_i32 = arith.constant 0 : i32
    %c0_i32_0 = arith.constant 0 : i32
    %c0_i32_1 = arith.constant 0 : i32
    return %c0_i32, %c0_i32_0 : i32, i32
  }
  func.func @transform_4(%arg0: i32) -> (i32, i32, i32) {
    %c0_i32 = arith.constant 0 : i32
    %c0_i32_0 = arith.constant 0 : i32
    %c0_i32_1 = arith.constant 0 : i32
    return %arg0, %c0_i32, %c0_i32_0 : i32, i32, i32
  }
}

</mosaic_0001>

<bundles_post_ra>
// kernel: diffusion_tcn_forward.1
= control target key start
LH: loop header
LB: loop body
LE: loop exit
PB: predicated region body
PF: predicated region fallthrough
CT: control target
= control target key end

     0   :  { %9 = vsyncpa [#allocation3], 0  ;;  %s1213_s0 = inlined_call_operand.vmem [shape: f32[2,4,16], index: 0, kind: input, shape index: {}]   ;;  %s1214_s1 = inlined_call_operand.vmem [shape: f32[2,8,1], index: 1, kind: input, shape index: {}]   ;;  %s1215_s2 = inlined_call_operand.vmem [shape: f32[56,48], index: 2, kind: input, shape index: {}]   ;;  %s1216_s3 = inlined_call_operand.vmem [shape: f32[8,11], index: 3, kind: input, shape index: {}]   ;;  %s1217_s4 = inlined_call_operand.hbm [shape: f32[2,4,16], index: 4, kind: output, shape index: {}]  }
   0x1   :  { %11 = vsyncpa [#allocation3 + $0x1], 0  ;;  %s999_s15 = smov 0   ;;  %s1001_s16 = smov 0  }
   0x2   :  { %s1003_s17 = smov 0   ;;  %s1005_s18 = smov 0  }
   0x3 LB: > { %s1020_s19 = sadd.s32 4294967295, %s954_s18   ;;  %s750_s20 = sadd.s32 4294967294, %s954_s18   ;;  %s954_s18 = sphi %s1005_s18, %s1223_s18   ;;  %s950_s17 = sphi %s1003_s17, %s1222_s17   ;;  %s946_s16 = sphi %s1001_s16, %s1221_s16   ;;  %s942_s15 = sphi %s999_s15, %s1220_s15  }
   0x4   : > { %s1024_s21 = sadd.s32 1, %s954_s18   ;;  %s118_s22 = sadd.s32 1, %s950_s17 }
   0x5   : > { %s115_s23 = ssub.s32 %s954_s18, %s1024_s21  ;;  %p128_p0 = scmp.ne.s32.totalorder %s950_s17, %s946_s16 }
   0x6   : > { %p116_p1 = scmp.eq.s32.totalorder %s115_s23, 0  ;;  %p129_p2 = scmp.eq.s32.totalorder %s1020_s19, 1 }
   0x7   : > { %p134_p3 = scmp.ne.s32.totalorder %s946_s16, %s942_s15  ;;  %p135_p4 = scmp.eq.s32.totalorder %s750_s20, 1 }
   0x8   : > { %s1035_s24 = scalar_select %p116_p1, %s950_s17, %s118_s22  }
   0x9   : > { %p1037_p5 = por %p129_p2, %p128_p0  ;;  %p1041_p6 = por %p135_p4, %p134_p3 }
   0xa   : > { %p753_p7 = scmp.ge.s32.totalorder %s954_s18, 1  ;;  %p173_p8 = scmp.lt.s32.totalorder %s954_s18, 3 }
   0xc   : > { %p174_p9 = pnand %p753_p7, %p173_p8 }
   0xd   : > { %p202_p10 = scmp.lt.s32.totalorder (!%p174_p9), %s1020_s19, 1  ;;  %s958_s10 = smov (!%p174_p9), 16  }
   0xe   : > { %177 = sbr.rel (%p174_p9) target bundleno = 3403 (0xd4b), region = 36  ;;  %s959_s11 = smov (!%p174_p9), 15  }
   0xf   : > { %s960_s12 = smov (!%p174_p9), 1   ;;  %s961_s13 = smov (!%p174_p9), 113  }
  0x10   : > { %s962_s14 = smov (!%p174_p9), 14   ;;  %s967_s5 = smov (!%p174_p9), 127  }
  0x11   : > { %s199_s28 = sand.u32 (!%p174_p9), 1, %s946_s16  }
  0x13   : > { %v956_v0 = vmov 0   ;;  %v1051_v1 = vld [vmem:[%s1216_s3] sm:$0xf]  ;;  %s1054_s29 = scalar_select %p202_p10, %s1020_s19, 1  ;;  %vm254_vm0 = vcmask 1043456   ;;  %vm250_vm1 = vcmask 31744   ;;  %v212_v4 = vlaneseq }
  0x14   : > { %831 = vset.pattern.permute.xlu0 %v956_v0  ;;  %847 = vset.pattern.permute.xlu1 %v956_v0  ;;  %v236_v2 = vld [vmem:[%s1215_s2] sm:$0xf]  ;;  %v957_v9 = vmov 0.0   ;;  %vm278_vm3 = vcmask 1047680   ;;  %v963_v27 = vmov 2   ;;  %v964_v28 = vmov 1  }
  0x15   : > { %247 = vperm.xlu0 %831, %v1051_v1   ;;  %s755_s30 = sshll.u32 %s1054_s29, 2  ;;  %v1065_v5 = vand.u32 127, %v212_v4  ;;  %v1089_v26 = vld [vmem:[%s1216_s3] sm:$0xff]  ;;  %837 = vset.pattern.permute.xlu2 %v964_v28  ;;  %vm310_vm5 = vcmask 97280   ;;  %v965_v51 = vmov 4   ;;  %v966_v52 = vmov 3  }
  0x16   : > { %s205_s7 = scalar_lea.vmem %s1213_s0, %s755_s30  ;;  %v237_v30 = vld [vmem:[%s1215_s2 + $0x4] sm:$0xff]  ;;  %v238_v56 = vld [vmem:[%s1215_s2 + $0xc] sm:$0xff]  ;;  %vm377_vm6 = vcmask 195584   ;;  %s756_s6 = sshll.u32 %s1054_s29, 3  ;;  %vm427_vm8 = vcmask 64512   ;;  %vm533_vm9 = vcmask 392192  }
  0x17   : > { %v210_v3 = vld [vmem:[%s205_s7] sm:$0xf]  ;;  %vm214_vm2 = vcmp.gt.s32.totalorder %v1065_v5, 0  ;;  %vm217_vm4 = vcmp.lt.s32.totalorder %v1065_v5, 15  ;;  %s209_s9 = scalar_lea.vmem %s1214_s1, %s756_s6  ;;  %s754_s30 = sshll.u32 %s199_s28, 2  ;;  %vm661_vm10 = vcmask 125952  }
  0x18   : > { %760 = vmatpush.msk.msra.mxu0 %vm254_vm0, %v210_v3  ;;  %v757_v10 = vsel %vm214_vm2, 1.0, %v957_v9  ;;  %v758_v15 = vsel %vm217_vm4, 1.0, %v957_v9  ;;  %s664_s29 = scalar_lea.sflag [#allocation3], %s199_s28 }
  0x19   : > { %761 = vmatmul.msk.f32.vlgmr.msra.gmra.mxu0 %vm250_vm1, %v236_v2 }
  0x1d   : > { %838 = vset.pattern.permute.xlu0 %v963_v27 }
  0x87   : > { %v248_v6 = vpop.permute.xlu0 %247 }
  0x96   : > { %v275_v7 = vpop.f32.mrf.mxu0 }
  0x97   : > { %v276_v8 = vadd.f32 %v275_v7, %v248_v6 }
  0x99   : > { %279 = vrot.lane.b32.xlu0 %v276_v8, %s958_s10  ;;  %v296_v11 = vrot.slane %v276_v8, 4 }
  0x9b   : > { %v832_v12 = vpack.i.bf16 %v296_v11, %v757_v10 }
  0x9d   : > { %833 = vrot.lane.b32.xlu2 %v832_v12, %s959_s11 }
  0xf7   : > { %v834_v16 = vpop.permute.xlu2 %833 }
  0xf8   : > { %v1075_v17 = vunpack.i.l.bf16 %v834_v16  ;;  %v836_v20 = vunpack.i.h.bf16 %v834_v16  ;;  %v239_v16 = vld [vmem:[%s1215_s2 + $0x14] sm:$0xff] }
 0x10b   : > { %v280_v13 = vpop.permute.xlu0 %279 }
 0x10c   : > { %v281_v14 = vsel %vm278_vm3, %v280_v13, %v276_v8 }
 0x10d   : > { %282 = vrot.lane.b32.xlu1 %v281_v14, %s958_s10  ;;  %v211_v14 = vld [vmem:[%s209_s9] sm:$0xff]  ;;  %s201_s9 = scalar_lea.vmem [#allocation2], %s754_s30 }
 0x115   : > { %291 = vrot.lane.b32.xlu1 %v758_v15, %s960_s12  ;;  %s676_s12 = sshll.u32 %s201_s9, 4  ;;  %s677_s12 = int_to_ptr.vmem [resolvable:$true] %s676_s12 }
 0x17f   : > { %v283_v18 = vpop.permute.xlu1 %282 }
 0x180   : > { %v284_v19 = vsel %vm278_vm3, %v283_v18, %v276_v8  ;;  %v224_v8 = vand.u32 1, %v1065_v5  ;;  %v240_v18 = vld [vmem:[%s1215_s2 + $0x1c] sm:$0xff] }
 0x181   : > { %v289_v21 = vmul.f32 %v1075_v17, %v284_v19 }
 0x182   : > { %vm232_vm7 = vcmp.eq.s32.totalorder %v224_v8, 0 }
 0x183   : > { %v303_v22 = vsel %vm254_vm0, %v289_v21, %v836_v20  ;;  %v759_v12 = vsel %vm232_vm7, 1.0, %v957_v9 }
 0x184   : > { %305 = vrot.lane.b32.xlu1 %v303_v22, %s961_s13  ;;  %v235_v13 = vsub.f32 1.0, %v759_v12 }
 0x187   : > { %v1081_v23 = vpop.permute.xlu1 %291 }
 0x188   : > { %v294_v24 = vmul.f32 %v1081_v23, %v284_v19 }
 0x18a   : > { %301 = vrot.lane.b32.xlu2 %v294_v24, %s962_s14  ;;  %v968_v24 = vmov 5  }
 0x192   : > { %339 = vperm.xlu2 %837, %v1089_v26  }
 0x19a   : > { %844 = vset.pattern.permute.xlu2 %v966_v52 }
 0x1e4   : > { %v302_v25 = vpop.permute.xlu2 %301 }
 0x1e5   : > { %307 = vrot.lane.b32.xlu0 %v302_v25, %s961_s13 }
 0x1ec   : > { %v340_v32 = vpop.permute.xlu2 %339 }
 0x1ed   : > { %344 = vperm.xlu0 %838, %v1089_v26  }
 0x1f5   : > { %845 = vset.pattern.permute.xlu0 %v965_v51 }
 0x1f6   : > { %v306_v31 = vpop.permute.xlu1 %305 }
 0x257   : > { %v308_v29 = vpop.permute.xlu0 %307 }
 0x258   : > { %762 = vmatpush.msk.msra.mxu1 %vm254_vm0, %v308_v29 }
 0x25a   : > { %331 = vmatpush.msra.mxu1 %v306_v31 }
 0x25b   : > { %763 = vmatmul.msk.f32.vlgmr.msra.gmra.mxu1 %vm310_vm5, %v237_v30 }
 0x25f   : > { %v345_v34 = vpop.permute.xlu0 %344 }
 0x2d8   : > { %v333_v33 = vpop.f32.mrf.mxu1 }
 0x2d9   : > { %v342_v35 = vmul.f32 %v340_v32, %v333_v33 }
 0x2db   : > { %v347_v36 = vadd.f32 %v345_v34, %v342_v35 }
 0x2dd   : > { %v348_v37 = vmul.f32 0.5, %v347_v36 }
 0x2df   : > { %884 = vtanh.f32 %v348_v37 }
 0x2e5   : > { %v885_v38 = vpop.eup %884 }
 0x2e6   : > { %v350_v39 = vmul.f32 0.5, %v885_v38 }
 0x2e8   : > { %v351_v40 = vadd.f32 0.5, %v350_v39 }
 0x2ea   : > { %v352_v41 = vmul.f32 %v351_v40, %v347_v36 }
 0x2ec   : > { %353 = vrot.lane.b32.xlu1 %v352_v41, %s958_s10 }
 0x35e   : > { %v354_v42 = vpop.permute.xlu1 %353 }
 0x35f   : > { %v355_v43 = vsel %vm278_vm3, %v354_v42, %v352_v41 }
 0x360   : > { %356 = vrot.lane.b32.xlu2 %v355_v43, %s958_s10 }
 0x368   : > { %362 = vrot.lane.b32.xlu2 %v352_v41, %s959_s11 }
 0x370   : > { %402 = vperm.xlu2 %844, %v1089_v26  }
 0x3ba   : > { %v357_v44 = vpop.permute.xlu2 %356 }
 0x3bb   : > { %v358_v45 = vsel %vm278_vm3, %v357_v44, %v352_v41 }
 0x3bc   : > { %v360_v46 = vmul.f32 %v358_v45, %v1081_v23  ;;  %v359_v47 = vmul.f32 %v1075_v17, %v358_v45 }
 0x3be   : > { %365 = vrot.lane.b32.xlu1 %v360_v46, %s962_s14 }
 0x3c2   : > { %v363_v48 = vpop.permute.xlu2 %362 }
 0x3c6   : > { %368 = vrot.lane.b32.xlu1 %v359_v47, %s961_s13 }
 0x3ca   : > { %v403_v58 = vpop.permute.xlu2 %402 }
 0x430   : > { %v366_v49 = vpop.permute.xlu1 %365 }
 0x431   : > { %v839_v50 = vpack.i.bf16 %v363_v48, %v366_v49 }
 0x433   : > { %840 = vrot.lane.b32.xlu0 %v839_v50, %s961_s13 }
 0x438   : > { %v369_v57 = vpop.permute.xlu1 %368 }
 0x43b   : > { %407 = vperm.xlu0 %845, %v1089_v26  }
 0x443   : > { %846 = vset.pattern.permute.xlu0 %v968_v24  ;;  %v972_v24 = vmov 9  }
 0x4a5   : > { %v841_v53 = vpop.permute.xlu0 %840 }
 0x4a6   : > { %v842_v54 = vunpack.i.l.bf16 %v841_v53  ;;  %v843_v55 = vunpack.i.h.bf16 %v841_v53  ;;  %v969_v53 = vmov 6  }
 0x4a8   : > { %394 = vmatpush.msra.mxu2 %v842_v54  ;;  %v970_v54 = vmov 7  }
 0x4aa   : > { %395 = vmatpush.msra.mxu2 %v843_v55 }
 0x4ac   : > { %396 = vmatpush.msra.mxu2 %v369_v57 }
 0x4ad   : > { %764 = vmatmul.msk.f32.vlgmr.msra.gmra.mxu2 %vm377_vm6, %v238_v56  ;;  %v408_v60 = vpop.permute.xlu0 %407 }
 0x530   : > { %v398_v59 = vpop.f32.mrf.mxu2 }
 0x531   : > { %v405_v61 = vmul.f32 %v403_v58, %v398_v59 }
 0x533   : > { %v410_v62 = vadd.f32 %v408_v60, %v405_v61 }
 0x535   : > { %v411_v63 = vmul.f32 0.5, %v410_v62 }
 0x537   : > { %886 = vtanh.f32 %v411_v63 }
 0x53d   : > { %v887_v0 = vpop.eup %886 }
 0x53e   : > { %v413_v2 = vmul.f32 0.5, %v887_v0  ;;  %v241_v0 = vld [vmem:[%s1215_s2 + $0x24] sm:$0xff] }
 0x540   : > { %v414_v3 = vadd.f32 0.5, %v413_v2 }
 0x542   : > { %v415_v4 = vmul.f32 %v414_v3, %v410_v62 }
 0x544   : > { %416 = vrot.lane.b32.xlu1 %v415_v4, %s958_s10 }
 0x5b6   : > { %v417_v6 = vpop.permute.xlu1 %416 }
 0x5b7   : > { %v418_v7 = vsel %vm278_vm3, %v417_v6, %v415_v4 }
 0x5b8   : > { %419 = vrot.lane.b32.xlu2 %v418_v7, %s958_s10 }
 0x612   : > { %v420_v10 = vpop.permute.xlu2 %419 }
 0x613   : > { %v421_v11 = vsel %vm278_vm3, %v420_v10, %v415_v4 }
 0x614   : > { %423 = vrot.lane.b32.xlu1 %v421_v11, %s967_s5  ;;  %s771_s5 = sshll.u32 %s1020_s19, 2 }
 0x615   : > { %s674_s8 = scalar_lea.hbm %s1217_s4, %s771_s5 }
 0x616   : > { %s678_s20 = sshll.u32 %s674_s8, 4  ;;  %s679_s20 = int_to_ptr.hbm [resolvable:$true] %s678_s20 }
 0x617   : > { %s906_s22 = sshra.s32 %s679_s20, 4  ;;  %s907_s22 = int_to_ptr.hbm [resolvable:$true] %s906_s22 }
 0x618   : > { %s908_s23 = scalar_lea.hbm %s907_s22, 4  ;;  %p913_p0 = scmp.lt.s32.totalorder %s907_s22, %s1217_s4 }
 0x619   : > { %p909_p11 = scmp.ne.s32.totalorder %s907_s22, %s908_s23 }
 0x61b   : > { %p910_p12 = pnand %p909_p11, %p1037_p5 }
 0x61c   : > { %465 = vrot.lane.b32.xlu1 %v235_v13, %s959_s11 }
 0x61d   : > { %p911_p13 = pneg %p910_p12 }
 0x624   : > { %481 = vperm.xlu1 %847, %v211_v14  }
 0x62c   : > { %874 = vset.pattern.permute.xlu1 %v970_v54 }
 0x686   : > { %v424_v15 = vpop.permute.xlu1 %423 }
 0x687   : > { %v426_v5 = vmax.f32 %v415_v4, %v424_v15 }
 0x689   : > { %449 = vmatpush.msra.mxu3 %v426_v5 }
 0x68a   : > { %765 = vmatmul.msk.f32.vlgmr.msra.gmra.mxu3 %vm427_vm8, %v239_v16 }
 0x68e   : > { %v466_v9 = vpop.permute.xlu1 %465 }
 0x692   : > { %766 = vmatmul.msk.f32.gmra.mxu3 %vm427_vm8, %v240_v18 }
 0x696   : > { %v482_v19 = vpop.permute.xlu1 %481 }
 0x697   : > { %v484_v20 = vadd.f32 %v482_v19, %v415_v4 }
 0x699   : > { %485 = vrot.lane.b32.xlu1 %v484_v20, %s958_s10 }
 0x70b   : > { %v486_v28 = vpop.permute.xlu1 %485 }
 0x70c   : > { %v487_v29 = vsel %vm278_vm3, %v486_v28, %v484_v20 }
 0x70d   : > { %v451_v21 = vpop.f32.mrf.mxu3 }
 0x70e   : > { %v457_v33 = vmul.f32 %v759_v12, %v451_v21 }
 0x715   : > { %v454_v22 = vpop.f32.mrf.mxu3 }
 0x716   : > { %458 = vrot.lane.b32.xlu2 %v454_v22, %s958_s10 }
 0x770   : > { %v459_v25 = vpop.permute.xlu2 %458 }
 0x771   : > { %v460_v27 = vsel %vm278_vm3, %v459_v25, %v454_v22 }
 0x772   : > { %461 = vrot.lane.b32.xlu0 %v460_v27, %s958_s10 }
 0x77a   : > { %475 = vperm.xlu0 %846, %v1089_v26  }
 0x782   : > { %491 = vrot.lane.b32.xlu0 %v487_v29, %s958_s10  ;;  %v973_v29 = vmov 10  }
 0x783   : > { %873 = vset.pattern.permute.xlu0 %v969_v53  ;;  %882 = vset.pattern.permute.xlu2 %v973_v29 }
 0x7e4   : > { %v462_v30 = vpop.permute.xlu0 %461 }
 0x7e5   : > { %v463_v31 = vsel %vm278_vm3, %v462_v30, %v454_v22  ;;  %v971_v22 = vmov 8  }
 0x7e6   : > { %v468_v32 = vmul.f32 %v466_v9, %v463_v31 }
 0x7e8   : > { %470 = vrot.lane.b32.xlu2 %v468_v32, %s961_s13 }
 0x7ec   : > { %v476_v36 = vpop.permute.xlu0 %475 }
 0x7f4   : > { %v492_v41 = vpop.permute.xlu0 %491 }
 0x7f5   : > { %v495_v42 = vsel %vm278_vm3, %v492_v41, %v484_v20 }
 0x7f6   : > { %v497_v45 = vmul.f32 %v1075_v17, %v495_v42  ;;  %v499_v46 = vmul.f32 %v495_v42, %v1081_v23 }
 0x842   : > { %v471_v34 = vpop.permute.xlu2 %470 }
 0x843   : > { %v473_v35 = vadd.f32 %v471_v34, %v457_v33 }
 0x845   : > { %v478_v37 = vadd.f32 %v476_v36, %v473_v35 }
 0x847   : > { %488 = vrot.lane.b32.xlu2 %v478_v37, %s958_s10  ;;  %v853_v40 = vpack.i.bf16 %v484_v20, %v478_v37 }
 0x8a1   : > { %v489_v38 = vpop.permute.xlu2 %488 }
 0x8a2   : > { %v490_v39 = vsel %vm278_vm3, %v489_v38, %v478_v37 }
 0x8a3   : > { %493 = vrot.lane.b32.xlu2 %v490_v39, %s958_s10  ;;  %v243_v39 = vld [vmem:[%s1215_s2 + $0x34] sm:$0xf] }
 0x8ab   : > { %854 = vrot.lane.b32.xlu2 %v853_v40, %s959_s11 }
 0x8fd   : > { %v494_v43 = vpop.permute.xlu2 %493 }
 0x8fe   : > { %v496_v44 = vsel %vm278_vm3, %v494_v43, %v478_v37 }
 0x8ff   : > { %v498_v47 = vmul.f32 %v1075_v17, %v496_v44  ;;  %v500_v48 = vmul.f32 %v496_v44, %v1081_v23 }
 0x901   : > { %v848_v49 = vpack.i.bf16 %v499_v46, %v500_v48  ;;  %v868_v50 = vpack.i.bf16 %v497_v45, %v498_v47 }
 0x903   : > { %849 = vrot.lane.b32.xlu1 %v848_v49, %s962_s14  ;;  %869 = vrot.lane.b32.xlu2 %v868_v50, %s961_s13 }
 0x905   : > { %v855_v51 = vpop.permute.xlu2 %854 }
 0x90b   : > { %864 = vrot.lane.b32.xlu1 %v855_v51, %s961_s13 }
 0x913   : > { %563 = vperm.xlu1 %874, %v1089_v26  }
 0x91b   : > { %881 = vset.pattern.permute.xlu1 %v972_v24 }
 0x95d   : > { %v870_v60 = vpop.permute.xlu2 %869 }
 0x95e   : > { %v871_v62 = vunpack.i.l.bf16 %v870_v60  ;;  %v872_v63 = vunpack.i.h.bf16 %v870_v60 }
 0x975   : > { %v850_v52 = vpop.permute.xlu1 %849 }
 0x976   : > { %859 = vrot.lane.b32.xlu0 %v850_v52, %s961_s13 }
 0x97d   : > { %v865_v57 = vpop.permute.xlu1 %864 }
 0x97e   : > { %558 = vperm.xlu0 %873, %v1089_v26   ;;  %v866_v59 = vunpack.i.l.bf16 %v865_v57  ;;  %v867_v61 = vunpack.i.h.bf16 %v865_v57 }
 0x985   : > { %v564_v4 = vpop.permute.xlu1 %563 }
 0x986   : > { %880 = vset.pattern.permute.xlu0 %v971_v22 }
 0x9e8   : > { %v860_v55 = vpop.permute.xlu0 %859 }
 0x9e9   : > { %v861_v56 = vunpack.i.l.bf16 %v860_v55  ;;  %v862_v58 = vunpack.i.h.bf16 %v860_v55 }
 0x9eb   : > { %547 = vmatpush.msrb.mxu0 %v861_v56 }
 0x9ed   : > { %548 = vmatpush.msrb.mxu0 %v862_v58 }
 0x9ef   : > { %549 = vmatpush.msrb.mxu0 %v866_v59 }
 0x9f0   : > { %v559_v2 = vpop.permute.xlu0 %558 }
 0x9f1   : > { %550 = vmatpush.msrb.mxu0 %v867_v61 }
 0x9f3   : > { %551 = vmatpush.msrb.mxu0 %v871_v62 }
 0x9f5   : > { %552 = vmatpush.msrb.mxu0 %v872_v63 }
 0x9f6   : > { %767 = vmatmul.msk.f32.vlgmr.msrb.gmra.mxu0 %vm533_vm9, %v241_v0 }
 0xa73   : > { %v554_v3 = vpop.f32.mrf.mxu0 }
 0xa74   : > { %v561_v6 = vmul.f32 %v559_v2, %v554_v3 }
 0xa76   : > { %v566_v7 = vadd.f32 %v564_v4, %v561_v6 }
 0xa78   : > { %v567_v8 = vmul.f32 0.5, %v566_v7 }
 0xa7a   : > { %888 = vtanh.f32 %v567_v8 }
 0xa80   : > { %v889_v10 = vpop.eup %888 }
 0xa81   : > { %v569_v11 = vmul.f32 0.5, %v889_v10 }
 0xa83   : > { %v570_v12 = vadd.f32 0.5, %v569_v11 }
 0xa85   : > { %v571_v13 = vmul.f32 %v570_v12, %v566_v7 }
 0xa87   : > { %581 = vrot.lane.b32.xlu0 %v571_v13, %s959_s11  ;;  %572 = vrot.lane.b32.xlu2 %v571_v13, %s958_s10 }
 0xa8f   : > { %620 = vperm.xlu0 %880, %v1089_v26  }
 0xa97   : > { %883 = vset.pattern.permute.xlu0 %v973_v29 }
 0xae1   : > { %v573_v14 = vpop.permute.xlu2 %572 }
 0xae2   : > { %v574_v15 = vsel %vm278_vm3, %v573_v14, %v571_v13 }
 0xae3   : > { %575 = vrot.lane.b32.xlu1 %v574_v15, %s958_s10  ;;  %s912_s10 = scalar_lea.hbm %s1217_s4, 8 }
 0xae4   : > { %p914_p1 = scmp.lt.s32.totalorder %s912_s10, %s908_s23 }
 0xae6   : > { %p915_p2 = por %p914_p1, %p913_p0 }
 0xae8   : > { %p916_p3 = pnand %p915_p2, %p911_p13 }
 0xaf9   : > { %v582_v19 = vpop.permute.xlu0 %581 }
 0xb55   : > { %v576_v5 = vpop.permute.xlu1 %575 }
 0xb56   : > { %v577_v16 = vsel %vm278_vm3, %v576_v5, %v571_v13 }
 0xb57   : > { %v579_v9 = vmul.f32 %v577_v16, %v1081_v23  ;;  %v578_v18 = vmul.f32 %v1075_v17, %v577_v16  ;;  %v242_v17 = vld [vmem:[%s1215_s2 + $0x2c] sm:$0xff] }
 0xb59   : > { %584 = vrot.lane.b32.xlu2 %v579_v9, %s962_s14 }
 0xb61   : > { %587 = vrot.lane.b32.xlu2 %v578_v18, %s961_s13 }
 0xb69   : > { %635 = vperm.xlu2 %882, %v1051_v1  }
 0xbb3   : > { %v585_v20 = vpop.permute.xlu2 %584 }
 0xbb4   : > { %v875_v21 = vpack.i.bf16 %v582_v19, %v585_v20 }
 0xbb6   : > { %876 = vrot.lane.b32.xlu1 %v875_v21, %s961_s13 }
 0xbbb   : > { %v588_v28 = vpop.permute.xlu2 %587 }
 0xbbe   : > { %625 = vperm.xlu1 %881, %v1089_v26   ;;  %v621_v26 = vpop.permute.xlu0 %620 }
 0xbc3   : > { %v636_v1 = vpop.permute.xlu2 %635 }
 0xc28   : > { %v877_v23 = vpop.permute.xlu1 %876 }
 0xc29   : > { %v878_v25 = vunpack.i.l.bf16 %v877_v23  ;;  %v879_v27 = vunpack.i.h.bf16 %v877_v23 }
 0xc2b   : > { %612 = vmatpush.msrb.mxu1 %v878_v25 }
 0xc2d   : > { %613 = vmatpush.msrb.mxu1 %v879_v27 }
 0xc2f   : > { %614 = vmatpush.msrb.mxu1 %v588_v28 }
 0xc30   : > { %768 = vmatmul.msk.f32.vlgmr.msrb.gmra.mxu1 %vm377_vm6, %v242_v17  ;;  %v626_v31 = vpop.permute.xlu1 %625 }
 0xcad   : > { %v616_v30 = vpop.f32.mrf.mxu1 }
 0xcae   : > { %v623_v32 = vmul.f32 %v621_v26, %v616_v30 }
 0xcb0   : > { %v628_v33 = vadd.f32 %v626_v31, %v623_v32 }
 0xcb2   : > { %v629_v34 = vmul.f32 0.5, %v628_v33 }
 0xcb4   : > { %890 = vtanh.f32 %v629_v34 }
 0xcba   : > { %v891_v35 = vpop.eup %890 }
 0xcbb   : > { %v631_v36 = vmul.f32 0.5, %v891_v35 }
 0xcbd   : > { %v632_v37 = vadd.f32 0.5, %v631_v36 }
 0xcbf   : > { %v633_v38 = vmul.f32 %v632_v37, %v628_v33 }
 0xcc1   : > { %656 = vmatpush.msrb.mxu2 %v633_v38 }
 0xcc2   : > { %769 = vmatmul.msk.f32.vlgmr.msrb.gmra.mxu2 %vm427_vm8, %v243_v39 }
 0xd45   : > { %v658_v40 = vpop.f32.mrf.mxu2 }
 0xd46   : > { %v659_v41 = vadd.f32 %v658_v40, %v636_v1 }
 0xd48   : > { %662 = vst.msk [vmem:[%s201_s9] sm:$0xf] %vm661_vm10, %v659_v41 }
 0xd49   : > { %919 = shalt.err (!%p916_p3)
}
 0xd4a   : > { %774 = dma.vmem_to_hbm [thread:$0]  (%p1037_p5), %s677_s12, 64, %s679_s20, %s664_s29  }
 0xd4b PF: > { %p780_p4 = scmp.ge.s32.totalorder %s954_s18, 2  ;;  %s690_s14 = sand.u32 1, %s942_s15  }
 0xd4c   : > { %s691_s28 = scalar_lea.sflag [#allocation3], %s690_s14 }
 0xd4d   : > { %p777_p7 = pnand %p780_p4, %p1041_p6 }
 0xd4f   : > { %p778_p8 = pneg %p777_p7 }
 0xd51   : > { %937 = dma.done.wait (%p778_p8), %s691_s28, 64  }
 0xd52   : > { %939 = vsyncadd (%p778_p8), %s691_s28, 4294967232  ;;  %p14_p9 = scmp.ge.s32.totalorder %s1024_s21, 4   ;;  %s1220_s15 = smov %s946_s16 }
 0xd53   : > { %s1221_s16 = smov %s950_s17  ;;  %s1222_s17 = smov %s1035_s24 }
 0xd54   : > { %s1223_s18 = smov %s1024_s21  ;;  %16 = sbr.rel (!%p14_p9) target bundleno = 3 (0x3), region = 74 }
 0xd59   :  { %697 = vsyncpa [#allocation3], 1 }
 0xd5a   :  { %699 = vsyncpa [#allocation3 + $0x1], 1 }

</bundles_post_ra>
